<compile_context>
chip_gen: v5e
topology: v5e:2x2
jax: 0.10.0
libtpu: 0.0.40
codegen_flags: <defaults>
</compile_context>

<pallas_src>
import functools
import math

import jax
import jax.numpy as jnp
from jax import lax
from jax.experimental import pallas as pl
from jax.experimental.pallas import tpu as pltpu


def _round_up(x, m):
    return ((x + m - 1) // m) * m


def _vmem_capacity_bytes():
    try:
        return int(pltpu.get_tpu_info().vmem_capacity_bytes)
    except Exception:
        return 64 * 1024 * 1024  # conservative fallback (v7x per-TC VMEM)


def _ls_kl_tile_kernel(pred_ref, tgt_ref, out_ref, *,
                       smooth_val, confidence, n_valid):
    """One row tile -> one (8,1) output block holding the tile's partial KL sum."""
    i = pl.program_id(0)
    x = pred_ref[...]                                   # (tile_n, C), native dtype
    tile_n, c = x.shape

    # log-softmax pieces along the class (lane) axis; keep max / subtract in the
    # input dtype (bf16 VPU on v6e/v7x), upcast only for the exp-accumulate.
    m = jnp.max(x, axis=-1, keepdims=True)
    z = (x - m).astype(jnp.float32)                                   # (tile_n, C)
    lse = jnp.log(jnp.sum(jnp.exp(z), axis=-1, keepdims=True))        # (tile_n, 1)

    # Since sum_c(true_dist)=1:  -sum_c t_c * logp_c  ==  lse - sum_c(w_c * z_c)
    col = lax.broadcasted_iota(jnp.int32, (tile_n, c), 1)
    w = jnp.where(col == tgt_ref[...],
                  jnp.float32(confidence), jnp.float32(smooth_val))
    wz = jnp.sum(w * z, axis=-1, keepdims=True)                       # (tile_n, 1)
    row_term = lse - wz

    # Mask rows beyond the true batch (ragged last block -> garbage rows).
    row = i * tile_n + lax.broadcasted_iota(jnp.int32, (tile_n, 1), 0)
    row_term = jnp.where(row < n_valid, row_term, jnp.float32(0.0))

    # Per-tile partial sum, stored in sublane 0 of this step's (8,1) output block.
    partial = jnp.sum(row_term, axis=0, keepdims=True)                # (1, 1)
    sub = lax.broadcasted_iota(jnp.int32, (8, 1), 0)
    out_ref[...] = jnp.where(sub == 0, partial, jnp.float32(0.0))


def label_smoothing_loss(pred, target, *, classes, smoothing=0.0, tile_n=1024):
    """pred: [N, C] float (f32 or bf16), target: [N] int -> scalar f32 loss."""
    assert pred.ndim == 2 and pred.shape[1] == classes
    n, c = pred.shape
    confidence = 1.0 - smoothing
    smooth_val = smoothing / (classes - 1)

    # ---- VMEM-aware tile sizing ----
    itemsize = jnp.dtype(pred.dtype).itemsize
    vmem_cap = _vmem_capacity_bytes()
    vmem_limit = max(32 << 20, min(int(0.70 * vmem_cap), 100 << 20))
    # Per-row VMEM footprint: 2x double-buffered pred tile (native dtype) plus
    # ~3 f32 intermediates (z, exp(z), w*z) of the same tile.
    bytes_per_row = c * (2 * itemsize + 3 * 4)
    budget_rows = max(8, (vmem_limit - (4 << 20)) // bytes_per_row)
    t = int(min(tile_n, budget_rows, 1024))
    if n > 8:  # keep >= 2 grid steps when possible (megacore sharding on v7x)
        t = min(t, _round_up(-(-n // 2), 8))
    t = min(t, _round_up(n, 8))
    t = max(8, (t // 8) * 8)

    g = -(-n // t)
    tgt2d = target.astype(jnp.int32).reshape(-1, 1)       # (N, 1)

    kernel = functools.partial(
        _ls_kl_tile_kernel,
        smooth_val=smooth_val,
        confidence=confidence,
        n_valid=n,
    )

    cost = pl.CostEstimate(
        flops=6 * n * c,
        transcendentals=n * c + n,
        bytes_accessed=n * c * itemsize + n * 4 + g * 8 * 4,
    )

    partials = pl.pallas_call(
        kernel,
        out_shape=jax.ShapeDtypeStruct((g * 8, 1), jnp.float32),
        grid=(g,),
        in_specs=[
            pl.BlockSpec((t, c), lambda i: (i, 0)),   # pred tile (input dtype)
            pl.BlockSpec((t, 1), lambda i: (i, 0)),   # target tile (int32)
        ],
        out_specs=pl.BlockSpec((8, 1), lambda i: (i, 0)),
        compiler_params=pltpu.CompilerParams(
            dimension_semantics=("parallel",),
            vmem_limit_bytes=vmem_limit,
        ),
        cost_estimate=cost,
    )(pred, tgt2d)

    # Data-independent sum(t * log t) per row, with 0*log(0) := 0.
    const_per_row = 0.0
    if smooth_val > 0.0:
        const_per_row += (classes - 1) * smooth_val * math.log(smooth_val)
    if confidence > 0.0:
        const_per_row += confidence * math.log(confidence)

    total = jnp.sum(partials) + jnp.float32(n * const_per_row)
    return total / jnp.float32(n * classes)


def _reference(pred, target, *, classes, smoothing):
    """Pure-JAX reference mirroring the PyTorch module."""
    logp = jax.nn.log_softmax(pred.astype(jnp.float32), axis=-1)
    smooth_val = smoothing / (classes - 1)
    true_dist = jnp.full_like(logp, smooth_val)
    true_dist = true_dist.at[jnp.arange(pred.shape[0]), target].set(1.0 - smoothing)
    safe_t = jnp.where(true_dist > 0, true_dist, 1.0)
    pointwise = jnp.where(true_dist > 0, true_dist * (jnp.log(safe_t) - logp), 0.0)
    return jnp.mean(pointwise)


if __name__ == "__main__":
    key = jax.random.PRNGKey(0)

    def run_case(n, c, smoothing, dtype, rtol, atol):
        kp, kt = jax.random.split(jax.random.fold_in(key, n * 1009 + c))
        pred = jax.random.normal(kp, (n, c), dtype=jnp.float32).astype(dtype)
        target = jax.random.randint(kt, (n,), 0, c, dtype=jnp.int32)
        loss = jax.block_until_ready(
            label_smoothing_loss(pred, target, classes=c, smoothing=smoothing))
        ref = _reference(pred, target, classes=c, smoothing=smoothing)
        assert jnp.allclose(loss, ref, rtol=rtol, atol=atol), \
            (n, c, smoothing, str(dtype), float(loss), float(ref))

    # Main case (matches the module's typical [N, C] logits / [N] targets).
    run_case(8, 32, 0.1, jnp.float32, 1e-5, 1e-5)
    # Ragged batch: grid of 2 tiles, unpadded input, in-kernel masking, smoothing=0.
    run_case(13, 160, 0.0, jnp.float32, 1e-5, 1e-5)
    # bf16 logits: DMA'd as bf16, max/subtract in bf16, f32 exp-accumulate.
    run_case(8, 32, 0.2, jnp.bfloat16, 1e-3, 1e-3)

    print("KERNEL_OK")
</pallas_src>

<mosaic_0001>
module attributes {stable_mosaic.version = 11 : i64} {
  func.func @_ls_kl_tile_kernel(%arg0: i32, %arg1: memref<8x32xf32, #tpu.memory_space<vmem>>, %arg2: memref<8x1xi32, #tpu.memory_space<vmem>>, %arg3: memref<8x1xf32, #tpu.memory_space<vmem>>) attributes {dimension_semantics = [#tpu.dimension_semantics<parallel>], iteration_bounds = array<i64: 1>, scalar_prefetch = 0 : i64, scratch_operands = 0 : i64, tpu.core_type = #tpu.core_type<tc>, window_params = [{transform_indices = @transform_0, window_bounds = array<i64: 8, 32>}, {transform_indices = @transform_1, window_bounds = array<i64: 8, 1>}, {transform_indices = @transform_2, window_bounds = array<i64: 8, 1>}]} {
    %c0 = arith.constant 0 : index
    %c0_0 = arith.constant 0 : index
    %0 = vector.load %arg1[%c0, %c0_0] : memref<8x32xf32, #tpu.memory_space<vmem>>, vector<8x32xf32>
    %cst = arith.constant dense<0xFF800000> : vector<8xf32>
    %1 = vector.multi_reduction <maximumf>, %0, %cst [1] : vector<8x32xf32> to vector<8xf32>
    %2 = vector.shape_cast %1 : vector<8xf32> to vector<8x1xf32>
    %3 = vector.broadcast %2 : vector<8x1xf32> to vector<8x32xf32>
    %4 = arith.subf %0, %3 : vector<8x32xf32>
    %5 = math.exp %4 : vector<8x32xf32>
    %cst_1 = arith.constant dense<0.000000e+00> : vector<8xf32>
    %6 = vector.multi_reduction <add>, %5, %cst_1 [1] : vector<8x32xf32> to vector<8xf32>
    %7 = vector.shape_cast %6 : vector<8xf32> to vector<8x1xf32>
    %8 = math.log %7 : vector<8x1xf32>
    %9 = tpu.iota {dimensions = array<i32: 1>} : vector<8x32xi32>
    %c0_2 = arith.constant 0 : index
    %c0_3 = arith.constant 0 : index
    %10 = vector.load %arg2[%c0_2, %c0_3] : memref<8x1xi32, #tpu.memory_space<vmem>>, vector<8x1xi32>
    %11 = vector.broadcast %10 : vector<8x1xi32> to vector<8x32xi32>
    %12 = arith.cmpi eq, %9, %11 : vector<8x32xi32>
    %cst_4 = arith.constant 0.899999976 : f32
    %cst_5 = arith.constant 0.0032258064 : f32
    %13 = vector.broadcast %cst_4 : f32 to vector<8x32xf32>
    %14 = vector.broadcast %cst_5 : f32 to vector<8x32xf32>
    %15 = arith.select %12, %13, %14 : vector<8x32xi1>, vector<8x32xf32>
    %16 = arith.mulf %15, %4 : vector<8x32xf32>
    %cst_6 = arith.constant dense<0.000000e+00> : vector<8xf32>
    %17 = vector.multi_reduction <add>, %16, %cst_6 [1] : vector<8x32xf32> to vector<8xf32>
    %18 = vector.shape_cast %17 : vector<8xf32> to vector<8x1xf32>
    %19 = arith.subf %8, %18 : vector<8x1xf32>
    %c8_i32 = arith.constant 8 : i32
    %20 = arith.muli %arg0, %c8_i32 : i32
    %21 = tpu.iota {dimensions = array<i32: 0>} : vector<8x1xi32>
    %22 = vector.broadcast %20 : i32 to vector<8x1xi32>
    %23 = arith.addi %22, %21 : vector<8x1xi32>
    %c8_i32_7 = arith.constant 8 : i32
    %24 = vector.broadcast %c8_i32_7 : i32 to vector<8x1xi32>
    %25 = arith.cmpi slt, %23, %24 : vector<8x1xi32>
    %cst_8 = arith.constant 0.000000e+00 : f32
    %26 = vector.broadcast %cst_8 : f32 to vector<8x1xf32>
    %27 = arith.select %25, %19, %26 : vector<8x1xi1>, vector<8x1xf32>
    %cst_9 = arith.constant dense<0.000000e+00> : vector<1xf32>
    %28 = vector.multi_reduction <add>, %27, %cst_9 [0] : vector<8x1xf32> to vector<1xf32>
    %29 = vector.shape_cast %28 : vector<1xf32> to vector<1x1xf32>
    %30 = tpu.iota {dimensions = array<i32: 0>} : vector<8x1xi32>
    %c0_i32 = arith.constant 0 : i32
    %31 = vector.broadcast %c0_i32 : i32 to vector<8x1xi32>
    %32 = arith.cmpi eq, %30, %31 : vector<8x1xi32>
    %cst_10 = arith.constant 0.000000e+00 : f32
    %33 = vector.shape_cast %29 : vector<1x1xf32> to vector<1x1xf32>
    %34 = vector.broadcast %33 : vector<1x1xf32> to vector<8x1xf32>
    %35 = vector.broadcast %cst_10 : f32 to vector<8x1xf32>
    %36 = arith.select %32, %34, %35 : vector<8x1xi1>, vector<8x1xf32>
    %c0_11 = arith.constant 0 : index
    %c0_12 = arith.constant 0 : index
    %37 = vector.load %arg3[%c0_11, %c0_12] : memref<8x1xf32, #tpu.memory_space<vmem>>, vector<8x1xf32>
    tpu.vector_store %arg3[%c0_11, %c0_12], %36 {strides = array<i32>} : memref<8x1xf32, #tpu.memory_space<vmem>>, vector<8x1xf32>,
    return
  }
  func.func @transform_0(%arg0: i32) -> (i32, i32) {
    %c0_i32 = arith.constant 0 : i32
    %c0_i32_0 = arith.constant 0 : i32
    return %arg0, %c0_i32 : i32, i32
  }
  func.func @transform_1(%arg0: i32) -> (i32, i32) {
    %c0_i32 = arith.constant 0 : i32
    %c0_i32_0 = arith.constant 0 : i32
    return %arg0, %c0_i32 : i32, i32
  }
  func.func @transform_2(%arg0: i32) -> (i32, i32) {
    %c0_i32 = arith.constant 0 : i32
    %c0_i32_0 = arith.constant 0 : i32
    return %arg0, %c0_i32 : i32, i32
  }
}

</mosaic_0001>

<bundles_post_ra>
// kernel: tpu_custom_call.1
= control target key start
LH: loop header
LB: loop body
LE: loop exit
PB: predicated region body
PF: predicated region fallthrough
CT: control target
= control target key end

     0   :  { %vm12_vm0 = vcmask 261120   ;;  %v65_v1 = vmov 0   ;;  %v24_v9 = vlaneseq  ;;  %v66_v12 = vmov 0.0032258064   ;;  %s94_s0 = inlined_call_operand.vmem [shape: f32[8,32], index: 0, kind: input, shape index: {}]   ;;  %s95_s1 = inlined_call_operand.vmem [shape: s32[8,1], index: 1, kind: input, shape index: {}]   ;;  %s96_s2 = inlined_call_operand.vmem [shape: f32[8,1], index: 2, kind: output, shape index: {}]  }
   0x1   :  { %v11_v0 = vld [vmem:[%s94_s0] sm:$0xff]  ;;  %60 = vset.pattern.permute.xlu0 %v65_v1  ;;  %vm52_vm3 = vcmask 7168  }
   0x2   :  { %v13_v2 = vsel %vm12_vm0, %v11_v0, -inf  ;;  %v26_v3 = vld [vmem:[%s95_s1] sm:$0xff]  ;;  %v25_v10 = vand.u32 127, %v24_v9  ;;  %v39_v24 = vshrl.u32 %v24_v9, 7 }
   0x3   :  { %14 = vmax.xlane.f32.xlu0 %v13_v2 }
   0x4   :  { %vm50_vm2 = vcmp.eq.s32.totalorder %v39_v24, 0 }
  0x17   :  { %28 = vperm.xlu0 %60, %v26_v3  }
  0x76   :  { %v15_v4 = vpop.xlane.xlu0 %14 }
  0x77   :  { %v16_v5 = vsub.f32 %v11_v0, %v15_v4 }
  0x79   :  { %v17_v6 = vmul.f32 1.442695, %v16_v5 }
  0x7b   :  { %61 = vpow2.f32 %v17_v6 }
  0x81   :  { %v62_v7 = vpop.eup %61 }
  0x82   :  { %v19_v8 = vsel %vm12_vm0, %v62_v7, 0.0 }
  0x83   :  { %20 = vadd.xlane.f32.xlu1 %v19_v8 }
  0x89   :  { %v29_v11 = vpop.permute.xlu0 %28 }
  0x8a   :  { %vm30_vm1 = vcmp.eq.s32.totalorder %v25_v10, %v29_v11 }
  0x8b   :  { %v31_v13 = vsel %vm30_vm1, 0.9, %v66_v12 }
  0x8c   :  { %v32_v14 = vmul.f32 %v31_v13, %v16_v5 }
  0x8e   :  { %v33_v15 = vsel %vm12_vm0, %v32_v14, 0.0 }
  0x8f   :  { %34 = vadd.xlane.f32.xlu1 %v33_v15 }
  0xf6   :  { %v21_v16 = vpop.xlane.xlu1 %20 }
  0xf7   :  { %63 = vlog2.f32 %v21_v16 }
  0xfd   :  { %v64_v17 = vpop.eup %63 }
  0xfe   :  { %v23_v18 = vmul.f32 0.6931472, %v64_v17 }
 0x102   :  { %v35_v19 = vpop.xlane.xlu1 %34 }
 0x103   :  { %v36_v20 = vsub.f32 %v23_v18, %v35_v19 }
 0x105   :  { %v44_v21 = vrot.slane %v36_v20, 4 }
 0x107   :  { %v45_v22 = vadd.f32 %v44_v21, %v36_v20 }
 0x109   :  { %v46_v23 = vrot.slane %v45_v22, 2 }
 0x10b   :  { %v47_v25 = vadd.f32 %v46_v23, %v45_v22 }
 0x10d   :  { %v48_v26 = vrot.slane %v47_v25, 1 }
 0x10f   :  { %v49_v27 = vadd.f32 %v48_v26, %v47_v25 }
 0x111   :  { %v51_v28 = vsel %vm50_vm2, %v49_v27, 0.0 }
 0x112   :  { %53 = vst.msk [vmem:[%s96_s2] sm:$0xff] %vm52_vm3, %v51_v28 }

</bundles_post_ra>
